<compile_context>
chip_gen: v7x
topology: tpu7x:2x2x1
jax: 0.10.0
libtpu: 0.0.40
codegen_flags: <defaults>
</compile_context>

<pallas_src>
import jax
import jax.numpy as jnp
from jax.experimental import pallas as pl
from jax.experimental.pallas import tpu as pltpu

STATE_DIM = 14
HIDDEN_DIM = 64
N_ACTIONS = 5
LANE_PAD = 128  # lane-dense output width (multiple of 128 -> unmasked vst + dense DMA)


def _round_up(x, m):
    return ((x + m - 1) // m) * m


def _cdiv(a, b):
    return (a + b - 1) // b


def _choose_tile(B, block_m):
    """Pick (bm, B_pad): balanced steps, >=2 steps for moderate B (v7x megacore),
    bm a multiple of 16, last-tile padding minimized."""
    n_steps = _cdiv(B, block_m)
    if B >= 32:  # enough rows to meaningfully split across two TensorCores
        n_steps = max(n_steps, 2)
    bm = _round_up(_cdiv(B, n_steps), 16)
    bm = max(16, min(bm, _round_up(block_m, 16)))
    B_pad = _round_up(B, bm)
    return bm, B_pad


def boids_mlp_kernel(x_ref, w1_ref, b1_ref, w2_ref, b2_ref, w3_ref, b3_ref, o_ref):
    # x_ref: (bm, STATE_DIM) bf16 tile of states; weights bf16; biases f32.
    x = x_ref[...]

    # Layer 1: Linear + ReLU (bf16 MXU matmul, f32 accumulate; elementwise kept f32)
    h1 = jnp.dot(x, w1_ref[...], preferred_element_type=jnp.float32) + b1_ref[...]
    h1 = jnp.maximum(h1, 0.0)

    # Layer 2: Linear + ReLU
    h2 = jnp.dot(h1.astype(w2_ref.dtype), w2_ref[...],
                 preferred_element_type=jnp.float32) + b2_ref[...]
    h2 = jnp.maximum(h2, 0.0)

    # Layer 3: Linear (logits), lane-padded to 128 columns (extra cols are zeros)
    logits = jnp.dot(h2.astype(w3_ref.dtype), w3_ref[...],
                     preferred_element_type=jnp.float32) + b3_ref[...]
    o_ref[...] = logits.astype(o_ref.dtype)  # bf16 store -> halves HBM writeback


def boids_policy_forward(states, params, *, block_m=2048,
                         compute_dtype=jnp.bfloat16, out_dtype=jnp.bfloat16):
    """Pallas implementation of BoidsPolicy.forward (returns logits, f32, [B, 5])."""
    B, sd = states.shape
    assert sd == STATE_DIM
    w1, b1, w2, b2, w3, b3 = params

    bm, B_pad = _choose_tile(B, block_m)

    # Cast states/weights to bf16 once; pad batch rows (sliced off below).
    x = states.astype(compute_dtype)
    if B_pad != B:
        x = jnp.pad(x, ((0, B_pad - B), (0, 0)))

    w1c = w1.astype(compute_dtype)
    w2c = w2.astype(compute_dtype)
    b1c = b1.astype(jnp.float32)
    b2c = b2.astype(jnp.float32)
    # Lane-pad last layer so the output store is unmasked (128-wide, fills v5e MXU N).
    w3p = jnp.pad(w3, ((0, 0), (0, LANE_PAD - N_ACTIONS))).astype(compute_dtype)
    b3p = jnp.pad(b3, ((0, 0), (0, LANE_PAD - N_ACTIONS))).astype(jnp.float32)

    grid = (B_pad // bm,)

    out_itemsize = jnp.dtype(out_dtype).itemsize
    flops = 2 * B_pad * (STATE_DIM * HIDDEN_DIM
                         + HIDDEN_DIM * HIDDEN_DIM
                         + HIDDEN_DIM * LANE_PAD)
    bytes_accessed = (B_pad * STATE_DIM * 2                      # bf16 states in
                      + B_pad * LANE_PAD * out_itemsize          # bf16 padded logits out
                      + (w1c.size + w2c.size + w3p.size) * 2     # bf16 weights
                      + (b1c.size + b2c.size + b3p.size) * 4)    # f32 biases

    out = pl.pallas_call(
        boids_mlp_kernel,
        out_shape=jax.ShapeDtypeStruct((B_pad, LANE_PAD), out_dtype),
        grid_spec=pltpu.PrefetchScalarGridSpec(
            num_scalar_prefetch=0,
            grid=grid,
            in_specs=[
                # states: tiled along batch
                pl.BlockSpec((bm, STATE_DIM), lambda i: (i, 0)),
                # weights / biases: full arrays, constant block index -> VMEM-resident
                pl.BlockSpec((STATE_DIM, HIDDEN_DIM), lambda i: (0, 0)),
                pl.BlockSpec((1, HIDDEN_DIM), lambda i: (0, 0)),
                pl.BlockSpec((HIDDEN_DIM, HIDDEN_DIM), lambda i: (0, 0)),
                pl.BlockSpec((1, HIDDEN_DIM), lambda i: (0, 0)),
                pl.BlockSpec((HIDDEN_DIM, LANE_PAD), lambda i: (0, 0)),
                pl.BlockSpec((1, LANE_PAD), lambda i: (0, 0)),
            ],
            # If a profile at large bm shows exposed output-writeback DMA, deepen the
            # output pipeline with: pipeline_mode=pl.Buffered(3) on this spec.
            out_specs=pl.BlockSpec((bm, LANE_PAD), lambda i: (i, 0)),
        ),
        compiler_params=pltpu.CompilerParams(
            dimension_semantics=("parallel",)),
        cost_estimate=pl.CostEstimate(
            flops=flops, transcendentals=0, bytes_accessed=bytes_accessed),
    )(x, w1c, b1c, w2c, b2c, w3p, b3p)

    # Strip padded batch rows (garbage) and padded logit columns (zeros); return f32
    # to match the PyTorch forward interface.
    return out[:B, :N_ACTIONS].astype(jnp.float32)


def init_params(key):
    """Deterministic init matching nn.Linear shapes (stored transposed: [in, out])."""
    k1, k2, k3, k4, k5, k6 = jax.random.split(key, 6)

    def linear(kw, kb, fan_in, fan_out):
        bound = 1.0 / jnp.sqrt(fan_in)
        w = jax.random.uniform(kw, (fan_in, fan_out), jnp.float32, -bound, bound)
        b = jax.random.uniform(kb, (1, fan_out), jnp.float32, -bound, bound)
        return w, b

    w1, b1 = linear(k1, k2, STATE_DIM, HIDDEN_DIM)
    w2, b2 = linear(k3, k4, HIDDEN_DIM, HIDDEN_DIM)
    w3, b3 = linear(k5, k6, HIDDEN_DIM, N_ACTIONS)
    return (w1, b1, w2, b2, w3, b3)


def reference_forward_bf16(states, params, compute_dtype=jnp.bfloat16):
    """Matches the kernel's numerics: bf16 operands, f32 accumulation/bias/ReLU."""
    w1, b1, w2, b2, w3, b3 = params
    x = states.astype(compute_dtype)
    h1 = jnp.maximum(
        jnp.dot(x, w1.astype(compute_dtype), preferred_element_type=jnp.float32) + b1, 0.0)
    h2 = jnp.maximum(
        jnp.dot(h1.astype(compute_dtype), w2.astype(compute_dtype),
                preferred_element_type=jnp.float32) + b2, 0.0)
    return jnp.dot(h2.astype(compute_dtype), w3.astype(compute_dtype),
                   preferred_element_type=jnp.float32) + b3


def reference_forward_f32(states, params):
    w1, b1, w2, b2, w3, b3 = params
    h1 = jnp.maximum(states @ w1 + b1, 0.0)
    h2 = jnp.maximum(h1 @ w2 + b2, 0.0)
    return h2 @ w3 + b3


if __name__ == "__main__":
    key = jax.random.PRNGKey(0)
    kp, kx, kx2 = jax.random.split(key, 3)

    params = init_params(kp)

    # Small demo batch (n_robots = 16): single grid step, bm = 16.
    batch = 16
    states = jax.random.normal(kx, (batch, STATE_DIM), jnp.float32)
    logits = jax.block_until_ready(boids_policy_forward(states, params))

    ref = reference_forward_bf16(states, params)
    assert logits.shape == (batch, N_ACTIONS)
    # bf16 output rounding adds ~0.4% relative error on top of the bf16-matmul path.
    assert jnp.allclose(logits, ref, atol=2e-2, rtol=2e-2), "mismatch vs bf16 reference"
    ref32 = reference_forward_f32(states, params)
    assert jnp.max(jnp.abs(logits - ref32)) < 0.15, "mismatch vs f32 reference"

    # Medium batch (non-multiple-of-16): exercises balanced 2-step grid + row padding.
    batch2 = 300
    states2 = jax.random.normal(kx2, (batch2, STATE_DIM), jnp.float32)
    logits2 = jax.block_until_ready(boids_policy_forward(states2, params))
    ref2 = reference_forward_bf16(states2, params)
    assert logits2.shape == (batch2, N_ACTIONS)
    assert jnp.allclose(logits2, ref2, atol=2e-2, rtol=2e-2), "mismatch vs bf16 reference (padded)"

    # TODO(synk): sample_control_batch / compute_control_probs_batch use
    # torch.multinomial + custom autograd (StochasticCategorical /
    # LearnableStochasticCategorical) -- host-side RNG / backward weighting, not part
    # of the forward hot path, so not implemented in-kernel. Fusing the softmax /
    # sampling-prep reduction into this kernel would shrink writeback further.

    print("KERNEL_OK")
</pallas_src>

<mosaic_0001>
module attributes {stable_mosaic.version = 11 : i64} {
  func.func @boids_mlp_kernel(%arg0: i32, %arg1: memref<16x14xbf16, #tpu.memory_space<vmem>>, %arg2: memref<14x64xbf16, #tpu.memory_space<vmem>>, %arg3: memref<1x64xf32, #tpu.memory_space<vmem>>, %arg4: memref<64x64xbf16, #tpu.memory_space<vmem>>, %arg5: memref<1x64xf32, #tpu.memory_space<vmem>>, %arg6: memref<64x128xbf16, #tpu.memory_space<vmem>>, %arg7: memref<1x128xf32, #tpu.memory_space<vmem>>, %arg8: memref<16x128xbf16, #tpu.memory_space<vmem>>) attributes {dimension_semantics = [#tpu.dimension_semantics<parallel>], iteration_bounds = array<i64: 1>, scalar_prefetch = 0 : i64, scratch_operands = 0 : i64, tpu.core_type = #tpu.core_type<tc>, window_params = [{transform_indices = @transform_0, window_bounds = array<i64: 16, 14>}, {pipeline_mode = #tpu.pipeline_mode<synchronous>, transform_indices = @transform_1, window_bounds = array<i64: 14, 64>}, {pipeline_mode = #tpu.pipeline_mode<synchronous>, transform_indices = @transform_2, window_bounds = array<i64: 1, 64>}, {pipeline_mode = #tpu.pipeline_mode<synchronous>, transform_indices = @transform_3, window_bounds = array<i64: 64, 64>}, {pipeline_mode = #tpu.pipeline_mode<synchronous>, transform_indices = @transform_4, window_bounds = array<i64: 1, 64>}, {pipeline_mode = #tpu.pipeline_mode<synchronous>, transform_indices = @transform_5, window_bounds = array<i64: 64, 128>}, {pipeline_mode = #tpu.pipeline_mode<synchronous>, transform_indices = @transform_6, window_bounds = array<i64: 1, 128>}, {transform_indices = @transform_7, window_bounds = array<i64: 16, 128>}]} {
    %c0 = arith.constant 0 : index
    %c0_0 = arith.constant 0 : index
    %0 = vector.load %arg1[%c0, %c0_0] : memref<16x14xbf16, #tpu.memory_space<vmem>>, vector<16x14xbf16>
    %c0_1 = arith.constant 0 : index
    %c0_2 = arith.constant 0 : index
    %1 = vector.load %arg2[%c0_1, %c0_2] : memref<14x64xbf16, #tpu.memory_space<vmem>>, vector<14x64xbf16>
    %cst = arith.constant dense<0.000000e+00> : vector<16x64xf32>
    %2 = tpu.matmul %0, %1, %cst {dimension_numbers = #tpu.dot_dimension_numbers<[1], [0], [0], [1], [0, 0, 1, 1], [], []>} : vector<16x14xbf16>, vector<14x64xbf16>, vector<16x64xf32> -> vector<16x64xf32>
    %c0_3 = arith.constant 0 : index
    %c0_4 = arith.constant 0 : index
    %3 = vector.load %arg3[%c0_3, %c0_4] : memref<1x64xf32, #tpu.memory_space<vmem>>, vector<1x64xf32>
    %4 = vector.broadcast %3 : vector<1x64xf32> to vector<16x64xf32>
    %5 = arith.addf %2, %4 : vector<16x64xf32>
    %cst_5 = arith.constant 0.000000e+00 : f32
    %6 = vector.broadcast %cst_5 : f32 to vector<16x64xf32>
    %7 = arith.maximumf %5, %6 : vector<16x64xf32>
    %8 = arith.truncf %7 : vector<16x64xf32> to vector<16x64xbf16>
    %c0_6 = arith.constant 0 : index
    %c0_7 = arith.constant 0 : index
    %9 = vector.load %arg4[%c0_6, %c0_7] : memref<64x64xbf16, #tpu.memory_space<vmem>>, vector<64x64xbf16>
    %cst_8 = arith.constant dense<0.000000e+00> : vector<16x64xf32>
    %10 = tpu.matmul %8, %9, %cst_8 {dimension_numbers = #tpu.dot_dimension_numbers<[1], [0], [0], [1], [0, 0, 1, 1], [], []>} : vector<16x64xbf16>, vector<64x64xbf16>, vector<16x64xf32> -> vector<16x64xf32>
    %c0_9 = arith.constant 0 : index
    %c0_10 = arith.constant 0 : index
    %11 = vector.load %arg5[%c0_9, %c0_10] : memref<1x64xf32, #tpu.memory_space<vmem>>, vector<1x64xf32>
    %12 = vector.broadcast %11 : vector<1x64xf32> to vector<16x64xf32>
    %13 = arith.addf %10, %12 : vector<16x64xf32>
    %cst_11 = arith.constant 0.000000e+00 : f32
    %14 = vector.broadcast %cst_11 : f32 to vector<16x64xf32>
    %15 = arith.maximumf %13, %14 : vector<16x64xf32>
    %16 = arith.truncf %15 : vector<16x64xf32> to vector<16x64xbf16>
    %c0_12 = arith.constant 0 : index
    %c0_13 = arith.constant 0 : index
    %17 = vector.load %arg6[%c0_12, %c0_13] : memref<64x128xbf16, #tpu.memory_space<vmem>>, vector<64x128xbf16>
    %cst_14 = arith.constant dense<0.000000e+00> : vector<16x128xf32>
    %18 = tpu.matmul %16, %17, %cst_14 {dimension_numbers = #tpu.dot_dimension_numbers<[1], [0], [0], [1], [0, 0, 1, 1], [], []>} : vector<16x64xbf16>, vector<64x128xbf16>, vector<16x128xf32> -> vector<16x128xf32>
    %c0_15 = arith.constant 0 : index
    %c0_16 = arith.constant 0 : index
    %19 = vector.load %arg7[%c0_15, %c0_16] : memref<1x128xf32, #tpu.memory_space<vmem>>, vector<1x128xf32>
    %20 = vector.broadcast %19 : vector<1x128xf32> to vector<16x128xf32>
    %21 = arith.addf %18, %20 : vector<16x128xf32>
    %22 = arith.truncf %21 : vector<16x128xf32> to vector<16x128xbf16>
    %c0_17 = arith.constant 0 : index
    %c0_18 = arith.constant 0 : index
    %23 = vector.load %arg8[%c0_17, %c0_18] : memref<16x128xbf16, #tpu.memory_space<vmem>>, vector<16x128xbf16>
    tpu.vector_store %arg8[%c0_17, %c0_18], %22 {strides = array<i32>} : memref<16x128xbf16, #tpu.memory_space<vmem>>, vector<16x128xbf16>,
    return
  }
  func.func @transform_0(%arg0: i32) -> (i32, i32) {
    %c0_i32 = arith.constant 0 : i32
    %c0_i32_0 = arith.constant 0 : i32
    return %arg0, %c0_i32 : i32, i32
  }
  func.func @transform_1(%arg0: i32) -> (i32, i32) {
    %c0_i32 = arith.constant 0 : i32
    %c0_i32_0 = arith.constant 0 : i32
    %c0_i32_1 = arith.constant 0 : i32
    return %c0_i32, %c0_i32_0 : i32, i32
  }
  func.func @transform_2(%arg0: i32) -> (i32, i32) {
    %c0_i32 = arith.constant 0 : i32
    %c0_i32_0 = arith.constant 0 : i32
    %c0_i32_1 = arith.constant 0 : i32
    return %c0_i32, %c0_i32_0 : i32, i32
  }
  func.func @transform_3(%arg0: i32) -> (i32, i32) {
    %c0_i32 = arith.constant 0 : i32
    %c0_i32_0 = arith.constant 0 : i32
    %c0_i32_1 = arith.constant 0 : i32
    return %c0_i32, %c0_i32_0 : i32, i32
  }
  func.func @transform_4(%arg0: i32) -> (i32, i32) {
    %c0_i32 = arith.constant 0 : i32
    %c0_i32_0 = arith.constant 0 : i32
    %c0_i32_1 = arith.constant 0 : i32
    return %c0_i32, %c0_i32_0 : i32, i32
  }
  func.func @transform_5(%arg0: i32) -> (i32, i32) {
    %c0_i32 = arith.constant 0 : i32
    %c0_i32_0 = arith.constant 0 : i32
    %c0_i32_1 = arith.constant 0 : i32
    return %c0_i32, %c0_i32_0 : i32, i32
  }
  func.func @transform_6(%arg0: i32) -> (i32, i32) {
    %c0_i32 = arith.constant 0 : i32
    %c0_i32_0 = arith.constant 0 : i32
    %c0_i32_1 = arith.constant 0 : i32
    return %c0_i32, %c0_i32_0 : i32, i32
  }
  func.func @transform_7(%arg0: i32) -> (i32, i32) {
    %c0_i32 = arith.constant 0 : i32
    %c0_i32_0 = arith.constant 0 : i32
    return %arg0, %c0_i32 : i32, i32
  }
}

</mosaic_0001>

<bundles_post_ra>
// kernel: tpu_custom_call.1
= control target key start
LH: loop header
LB: loop body
LE: loop exit
PB: predicated region body
PF: predicated region fallthrough
CT: control target
= control target key end

     0   :  { %12 = vsyncpa [#allocation3], 0  ;;  %s711_s0 = inlined_call_operand.hbm [shape: bf16[16,14], index: 0, kind: input, shape index: {}]   ;;  %s712_s1 = inlined_call_operand.hbm [shape: bf16[14,64], index: 1, kind: input, shape index: {}]   ;;  %s713_s2 = inlined_call_operand.vmem [shape: f32[1,64], index: 2, kind: input, shape index: {}]   ;;  %s714_s3 = inlined_call_operand.hbm [shape: bf16[64,64], index: 3, kind: input, shape index: {}]   ;;  %s715_s4 = inlined_call_operand.vmem [shape: f32[1,64], index: 4, kind: input, shape index: {}]   ;;  %s716_s5 = inlined_call_operand.hbm [shape: bf16[64,128], index: 5, kind: input, shape index: {}]   ;;  %s717_s6 = inlined_call_operand.vmem [shape: f32[1,128], index: 6, kind: input, shape index: {}]   ;;  %s718_s7 = inlined_call_operand.hbm [shape: bf16[16,128], index: 7, kind: output, shape index: {}]  }
   0x1   :  { %13 = vsyncpa [#allocation6], 0 }
   0x2   :  { %14 = vsyncpa [#allocation9], 0 }
   0x3   :  { %15 = vsyncpa [#allocation4], 0  ;;  %s559_s24 = smov [#allocation5]   ;;  %s560_s26 = smov [#allocation2]  }
   0x4   :  { %s33_s25 = sshll.u32 %s559_s24, 4  ;;  %s21_s27 = sshll.u32 %s560_s26, 4  ;;  %s34_s25 = int_to_ptr.vmem [resolvable:$true] %s33_s25  ;;  %s608_s27 = int_to_ptr.vmem [resolvable:$true] %s21_s27 }
   0x5   :  { %s441_s30 = scalar_lea.hbm %s712_s1, 128 }
   0x6   :  { %p442_p0 = scmp.ne.s32.totalorder %s712_s1, %s441_s30  ;;  %p445_p1 = scmp.lt.u32.totalorder %s441_s30, %s712_s1 }
   0x8   :  { %p447_p2 = pnand %p445_p1, %p442_p0 }
   0xa   :  { %450 = shalt.err (!%p447_p2)
}
   0xb   :  { %s451_s12 = scalar_lea.vmem %s34_s25, 128  ;;  %p456_p4 = scmp.lt.s32.totalorder %s34_s25, %s34_s25 }
   0xc   :  { %p452_p3 = scmp.ne.s32.totalorder %s34_s25, %s451_s12  ;;  %p457_p5 = scmp.lt.s32.totalorder %s451_s12, %s451_s12 }
   0xe   :  { %p458_p6 = por %p457_p5, %p456_p4 }
  0x10   :  { %p459_p7 = pnand %p458_p6, %p452_p3 }
  0x12   :  { %462 = shalt.err (!%p459_p7)
}
  0x13   :  { %s561_s13 = smov 64   ;;  %s562_s14 = smov 4  }
  0x14   :  { %39 = dma.hbm_to_vmem [thread:$0]  %s712_s1, 128, %s34_s25, [#allocation6], %s561_s13, %s561_s13, %s562_s14  }
  0x15   :  { %s463_s19 = scalar_lea.hbm %s711_s0, 128 }
  0x16   :  { %p464_p8 = scmp.ne.s32.totalorder %s711_s0, %s463_s19  ;;  %p467_p9 = scmp.lt.u32.totalorder %s463_s19, %s711_s0 }
  0x18   :  { %p469_p10 = pnand %p467_p9, %p464_p8 }
  0x1a   :  { %472 = shalt.err (!%p469_p10)
}
  0x1b   :  { %s473_s24 = scalar_lea.vmem %s608_s27, 128  ;;  %p478_p12 = scmp.lt.s32.totalorder %s608_s27, %s608_s27 }
  0x1c   :  { %p474_p11 = scmp.ne.s32.totalorder %s608_s27, %s473_s24  ;;  %p479_p13 = scmp.lt.s32.totalorder %s473_s24, %s473_s24 }
  0x1e   :  { %p480_p0 = por %p479_p13, %p478_p12 }
  0x20   :  { %p481_p1 = pnand %p480_p0, %p474_p11 }
  0x22   :  { %484 = shalt.err (!%p481_p1)
}
  0x23   :  { %27 = dma.hbm_to_vmem [thread:$0]  %s711_s0, 128, %s608_s27, [#allocation3], %s561_s13, %s561_s13, %s562_s14  }
  0x24   :  { %s563_s26 = smov [#allocation7]   ;;  %s564_s29 = smov [#allocation8]  }
  0x25   :  { %s47_s28 = sshll.u32 %s563_s26, 4  ;;  %s61_s30 = sshll.u32 %s564_s29, 4  ;;  %s48_s28 = int_to_ptr.vmem [resolvable:$true] %s47_s28  ;;  %s645_s30 = int_to_ptr.vmem [resolvable:$true] %s61_s30 }
  0x26   :  { %s485_s10 = scalar_lea.hbm %s714_s3, 512 }
  0x27   :  { %p486_p2 = scmp.ne.s32.totalorder %s714_s3, %s485_s10  ;;  %p489_p3 = scmp.lt.u32.totalorder %s485_s10, %s714_s3 }
  0x29   :  { %p491_p4 = pnand %p489_p3, %p486_p2 }
  0x2b   :  { %494 = shalt.err (!%p491_p4)
}
  0x2c   :  { %s495_s0 = scalar_lea.vmem %s48_s28, 512  ;;  %p500_p6 = scmp.lt.s32.totalorder %s48_s28, %s48_s28 }
  0x2d   :  { %p496_p5 = scmp.ne.s32.totalorder %s48_s28, %s495_s0  ;;  %p501_p7 = scmp.lt.s32.totalorder %s495_s0, %s495_s0 }
  0x2f   :  { %p502_p8 = por %p501_p7, %p500_p6 }
  0x31   :  { %p503_p9 = pnand %p502_p8, %p496_p5 }
  0x33   :  { %506 = shalt.err (!%p503_p9)
}
  0x34   :  { %53 = dma.hbm_to_vmem [thread:$0]  %s714_s3, 512, %s48_s28, [#allocation6], %s561_s13, %s561_s13, %s562_s14  }
  0x35   :  { %s507_s20 = scalar_lea.hbm %s716_s5, 512 }
  0x36   :  { %p508_p10 = scmp.ne.s32.totalorder %s716_s5, %s507_s20  ;;  %p511_p11 = scmp.lt.u32.totalorder %s507_s20, %s716_s5 }
  0x38   :  { %p513_p12 = pnand %p511_p11, %p508_p10 }
  0x3a   :  { %516 = shalt.err (!%p513_p12)
}
  0x3b   :  { %s517_s1 = scalar_lea.vmem %s645_s30, 512  ;;  %p522_p0 = scmp.lt.s32.totalorder %s645_s30, %s645_s30 }
  0x3c   :  { %p518_p13 = scmp.ne.s32.totalorder %s645_s30, %s517_s1  ;;  %p523_p1 = scmp.lt.s32.totalorder %s517_s1, %s517_s1 }
  0x3e   :  { %p524_p2 = por %p523_p1, %p522_p0 }
  0x40   :  { %p525_p3 = pnand %p524_p2, %p518_p13 }
  0x42   :  { %528 = shalt.err (!%p525_p3)
}
  0x43   :  { %67 = dma.hbm_to_vmem [thread:$0]  %s716_s5, 512, %s645_s30, [#allocation9], %s561_s13, %s561_s13, %s562_s14  }
  0x44   :  { %551 = dma.done.wait [#allocation3], 128  }
  0x45   :  { %552 = vsyncadd [#allocation3], 4294967168 }
  0x46   :  { %553 = dma.done.wait [#allocation6], 640  }
  0x47   :  { %554 = vsyncadd [#allocation6], 4294966656 }
  0x48   :  { %555 = dma.done.wait [#allocation9], 512  }
  0x49   :  { %556 = vsyncadd [#allocation9], 4294966784  ;;  %v565_v0 = vmov 0.0   ;;  %vm566_vm0 = vmmov 0   ;;  %vm108_vm1 = vcmask 1046528   ;;  %v432_v2 = vld [vmem:[#allocation2] sm:$0xff]  }
  0x4a   :  { %392 = vmatprep.subr.bf16.mxu0 %v565_v0  ;;  %394 = vmatprep.mubr.msk.bf16.mxu0 %vm566_vm0, %v565_v0  ;;  %v431_v1 = vld [vmem:[#allocation5] sm:$0x7f]   ;;  %v433_v4 = vld [vmem:[#allocation7] sm:$0xff]   ;;  %vm104_vm2 = vcmask 113664   ;;  %v434_v5 = vld [vmem:[#allocation7 + $0x8] sm:$0xff]   ;;  %vm195_vm3 = vcmask 523264  }
  0x4b   :  { %398 = vmatprep.subr.bf16.mxu1 %v565_v0  ;;  %406 = vmatprep.mubr.msk.bf16.mxu1 %vm566_vm0, %v565_v0  ;;  %v110_v3 = vsel %vm108_vm1, %v431_v1, 0  ;;  %v435_v6 = vld [vmem:[#allocation7 + $0x10] sm:$0xff]   ;;  %v436_v7 = vld [vmem:[#allocation7 + $0x18] sm:$0xff]   ;;  %v437_v8 = vld [vmem:[#allocation8] sm:$0xff]   ;;  %s567_s8 = smov [#allocation10]  }
  0x4c   :  { %393 = vmatpush3.bf16.msra.mxu0 %v110_v3  ;;  %399 = vmatpush3.bf16.msra.mxu1 %v433_v4  ;;  %v438_v9 = vld [vmem:[#allocation8 + $0x8] sm:$0xff]   ;;  %v355_v10 = vld [vmem:[%s713_s2] ss:$0 sm:$0xff]  ;;  %v440_v21 = vld [vmem:[#allocation8 + $0x18] sm:$0xff]  }
  0x4d   :  { %410 = vmatprep.subr.bf16.mxu0 %v565_v0  ;;  %400 = vmatprep.subr.bf16.mxu1 %v565_v0  ;;  %v439_v20 = vld [vmem:[#allocation8 + $0x10] sm:$0xff]  }
  0x4e   :  { %v359_v22 = vld [vmem:[%s715_s4] ss:$0 sm:$0xff]  ;;  %s341_s4 = sshll.u32 %s567_s8, 4  ;;  %s342_s4 = int_to_ptr.vmem [resolvable:$true] %s341_s4 }
  0x4f   :  { %395 = vmatmul.mubr.msk.bf16.vlgmr.msra.gmra.mrb[0].mxu0 %vm104_vm2, %v432_v2  ;;  %v365_v32 = vld [vmem:[%s717_s6] ss:$0 sm:$0xff]  ;;  %s529_s9 = scalar_lea.vmem %s342_s4, 128  ;;  %p534_p5 = scmp.lt.s32.totalorder %s342_s4, %s342_s4 }
  0x50   :  { %418 = vmatprep.mubr.msk.bf16.mxu0 %vm566_vm0, %v565_v0  ;;  %401 = vmatpush3.bf16.msra.mxu1 %v434_v5  ;;  %p530_p4 = scmp.ne.s32.totalorder %s342_s4, %s529_s9  ;;  %p535_p6 = scmp.lt.s32.totalorder %s529_s9, %s529_s9 }
  0x51   :  { %402 = vmatprep.subr.bf16.mxu1 %v565_v0  ;;  %411 = vmatpush3.bf16.msra.mxu0 %v437_v8 }
  0x52   :  { %412 = vmatprep.subr.bf16.mxu0 %v565_v0  ;;  %p536_p7 = por %p535_p6, %p534_p5 }
  0x54   :  { %403 = vmatpush3.bf16.msra.mxu1 %v435_v6  ;;  %p537_p8 = pnand %p536_p7, %p530_p4 }
  0x55   :  { %404 = vmatprep.subr.bf16.mxu1 %v565_v0  ;;  %413 = vmatpush3.bf16.msra.mxu0 %v438_v9 }
  0x56   :  { %414 = vmatprep.subr.bf16.mxu0 %v565_v0 }
  0x58   :  { %405 = vmatpush3.bf16.msra.mxu1 %v436_v7 }
  0x59   :  { %415 = vmatpush3.bf16.msra.mxu0 %v439_v20 }
  0x5a   :  { %416 = vmatprep.subr.bf16.mxu0 %v565_v0 }
  0x5d   :  { %417 = vmatpush3.bf16.msra.mxu0 %v440_v21 }
 0x122   :  { %v146_v11 = vpop.f32.mrb[0].mxu0 }
 0x123   :  { %v147_v12 = vadd.f32 %v355_v10, %v146_v11  ;;  %v396_v13 = vpop.f32.mrb[1].mxu0 }
 0x124   :  { %v149_v14 = vpop.f32.mrb[2].mxu0 }
 0x125   :  { %v150_v15 = vadd.f32 %v355_v10, %v149_v14  ;;  %v397_v16 = vpop.f32.mrb[3].mxu0  ;;  %v153_v17 = vmax.f32 %v147_v12, 0.0 }
 0x127   :  { %v154_v18 = vmax.f32 %v150_v15, 0.0 }
 0x129   :  { %v155_v19 = vpack.c.bf16 %v154_v18, %v153_v17 }
 0x12b   :  { %407 = vmatmul.mubr.msk.bf16.vlgmr.msra.gmra.mrb[0].mxu1 %vm195_vm3, %v155_v19 }
 0x1fe   :  { %v233_v23 = vpop.f32.mrb[0].mxu1 }
 0x1ff   :  { %v234_v24 = vadd.f32 %v359_v22, %v233_v23  ;;  %v408_v25 = vpop.f32.mrb[1].mxu1 }
 0x200   :  { %v236_v26 = vpop.f32.mrb[2].mxu1 }
 0x201   :  { %v237_v27 = vadd.f32 %v359_v22, %v236_v26  ;;  %v409_v28 = vpop.f32.mrb[3].mxu1  ;;  %v240_v29 = vmax.f32 %v234_v24, 0.0 }
 0x203   :  { %v241_v30 = vmax.f32 %v237_v27, 0.0 }
 0x205   :  { %v242_v31 = vpack.c.bf16 %v241_v30, %v240_v29 }
 0x207   :  { %419 = vmatmul.mubr.msk.bf16.vlgmr.msra.gmra.mrb[4].mxu0 %vm195_vm3, %v242_v31 }
 0x2da   :  { %v319_v33 = vpop.f32.mrb[4].mxu0 }
 0x2db   :  { %v420_v34 = vpop.f32.mrb[5].mxu0  ;;  %v320_v36 = vadd.f32 %v365_v32, %v319_v33 }
 0x2dc   :  { %v322_v35 = vpop.f32.mrb[6].mxu0 }
 0x2dd   :  { %v323_v37 = vadd.f32 %v365_v32, %v322_v35  ;;  %v421_v38 = vpop.f32.mrb[7].mxu0 }
 0x2df   :  { %v378_v39 = vpack.c.bf16 %v323_v37, %v320_v36 }
 0x2e1   :  { %379 = vst [vmem:[#allocation10] sm:$0xff] %v378_v39  }
 0x2e2   :  { %540 = shalt.err (!%p537_p8)
}
 0x2e3   :  { %s541_s11 = scalar_lea.hbm %s718_s7, 128 }
 0x2e4   :  { %p542_p9 = scmp.ne.s32.totalorder %s718_s7, %s541_s11  ;;  %p545_p10 = scmp.lt.u32.totalorder %s541_s11, %s718_s7 }
 0x2e6   :  { %p547_p11 = pnand %p545_p10, %p542_p9 }
 0x2e8   :  { %550 = shalt.err (!%p547_p11)
}
 0x2e9   :  { %347 = dma.vmem_to_hbm [thread:$0]  %s342_s4, 128, %s718_s7, [#allocation4], %s561_s13, %s561_s13, %s562_s14  }
 0x2ea   :  { %557 = dma.done.wait [#allocation4], 128  }
 0x2eb   :  { %558 = vsyncadd [#allocation4], 4294967168 }
 0x2ec   :  { %351 = vsyncpa [#allocation3], 1 }
 0x2ed   :  { %352 = vsyncpa [#allocation6], 1 }
 0x2ee   :  { %353 = vsyncpa [#allocation9], 1 }
 0x2ef   :  { %354 = vsyncpa [#allocation4], 1 }

</bundles_post_ra>
